<compile_context>
chip_gen: v6e
topology: v6e:2x2x1
jax: 0.10.0
libtpu: 0.0.40
codegen_flags: <defaults>
</compile_context>

<pallas_src>
import jax
import jax.numpy as jnp
from jax.experimental import pallas as pl
from jax.experimental.pallas import tpu as pltpu

IN_FEATURES = 300
OUT_FEATURES = 4

# Default batch tile: large enough to amortize per-grid-step overhead at
# v7x/v6e HBM bandwidth, small enough (with the lane-dense output) that the
# double-buffered x tiles fit every generation's VMEM.
DEFAULT_TB = 8192
# Raised scoped-VMEM limit (v5e default is 16 MiB; usage here is ~25 MiB at
# TB=8192; stays well under v7x's 64 MiB physical VMEM).
VMEM_LIMIT_BYTES = 40 << 20


def _linear_softmax_kernel(x_ref, w_ref, ot_ref):
    # [tb, 300] @ [300, 4] -> [tb, 4] on the MXU, f32 accumulation.
    y = jnp.dot(
        x_ref[...],
        w_ref[...],
        preferred_element_type=jnp.float32,
        precision=jax.lax.Precision.HIGHEST,
    )
    # Switch to the lane-dense orientation (4, tb): softmax math touches far
    # fewer vregs and the output store below is a dense (unmasked) store.
    yt = y.T  # (OUT_FEATURES, tb)
    # Numerically-stable softmax over the feature axis (axis=0 here).
    m = jnp.max(yt, axis=0, keepdims=True)
    e = jnp.exp(yt - m)
    denom = jnp.sum(e, axis=0, keepdims=True)
    # Exact divide: kernel is HBM-bound, the VPU divide is free.
    ot_ref[...] = (e / denom).astype(ot_ref.dtype)


def net_forward(x, w, *, tb=DEFAULT_TB):
    """x: [B, 300], w: [300, 4] -> [B, 4] softmax probabilities (f32)."""
    B = x.shape[0]

    if tb >= B:
        # Single full-extent block: no padding, no masking, minimal VMEM.
        tb = B
    else:
        # Multi-block case: keep the tile a multiple of 128 so the transposed
        # (4, tb) output block is lane-aligned (ragged last block is masked).
        tb = max(128, (tb // 128) * 128)

    num_tiles = pl.cdiv(B, tb)  # no jnp.pad of x — ragged tail handled by Pallas

    out_t = pl.pallas_call(
        _linear_softmax_kernel,
        out_shape=jax.ShapeDtypeStruct((OUT_FEATURES, B), jnp.float32),
        grid=(num_tiles,),
        in_specs=[
            # Stream x by batch tile — double-buffered by Pallas, overlaps the
            # HBM transfer with compute.
            pl.BlockSpec((tb, IN_FEATURES), lambda i: (i, 0)),
            # Tiny weight maps to the same block every step -> stays resident
            # in VMEM instead of being re-fetched per tile.
            pl.BlockSpec((IN_FEATURES, OUT_FEATURES), lambda i: (0, 0)),
        ],
        # Lane-dense transposed output: (4, tb) block of a (4, B) array.
        out_specs=pl.BlockSpec((OUT_FEATURES, tb), lambda i: (0, i)),
        compiler_params=pltpu.CompilerParams(
            dimension_semantics=("parallel",),
            vmem_limit_bytes=VMEM_LIMIT_BYTES,
        ),
    )(x, w)

    # Transpose the tiny [4, B] result back to the module's [B, 4] layout.
    return out_t.T


def init_params(key):
    # Match nn.Linear default init: U(-1/sqrt(fan_in), 1/sqrt(fan_in)), no bias.
    bound = 1.0 / jnp.sqrt(jnp.float32(IN_FEATURES))
    w = jax.random.uniform(
        key, (IN_FEATURES, OUT_FEATURES), dtype=jnp.float32,
        minval=-bound, maxval=bound)
    return w


if __name__ == "__main__":
    key = jax.random.PRNGKey(0)
    k_w, k_x = jax.random.split(key)

    B = 8
    w = init_params(k_w)
    x = jax.random.normal(k_x, (B, IN_FEATURES), dtype=jnp.float32)

    out = net_forward(x, w)
    out = jax.block_until_ready(out)

    # Reference (full-precision matmul so the comparison is apples-to-apples
    # on hardware that defaults f32 matmuls to bf16 passes).
    y_ref = jnp.dot(x, w, precision=jax.lax.Precision.HIGHEST)
    ref = jax.nn.softmax(y_ref, axis=1)

    assert out.shape == (B, OUT_FEATURES)
    assert jnp.allclose(out, ref, atol=1e-4, rtol=1e-4), "mismatch vs reference"
    assert jnp.allclose(jnp.sum(out, axis=1), 1.0, atol=1e-5)

    print("KERNEL_OK")
</pallas_src>

<mosaic_0001>
module attributes {stable_mosaic.version = 11 : i64} {
  func.func @_linear_softmax_kernel(%arg0: i32, %arg1: memref<8x300xf32, #tpu.memory_space<vmem>>, %arg2: memref<300x4xf32, #tpu.memory_space<vmem>>, %arg3: memref<4x8xf32, #tpu.memory_space<vmem>>) attributes {dimension_semantics = [#tpu.dimension_semantics<parallel>], iteration_bounds = array<i64: 1>, scalar_prefetch = 0 : i64, scratch_operands = 0 : i64, tpu.core_type = #tpu.core_type<tc>, window_params = [{transform_indices = @transform_0, window_bounds = array<i64: 8, 300>}, {pipeline_mode = #tpu.pipeline_mode<synchronous>, transform_indices = @transform_1, window_bounds = array<i64: 300, 4>}, {transform_indices = @transform_2, window_bounds = array<i64: 4, 8>}]} {
    %c0 = arith.constant 0 : index
    %c0_0 = arith.constant 0 : index
    %0 = vector.load %arg1[%c0, %c0_0] : memref<8x300xf32, #tpu.memory_space<vmem>>, vector<8x300xf32>
    %c0_1 = arith.constant 0 : index
    %c0_2 = arith.constant 0 : index
    %1 = vector.load %arg2[%c0_1, %c0_2] : memref<300x4xf32, #tpu.memory_space<vmem>>, vector<300x4xf32>
    %cst = arith.constant dense<0.000000e+00> : vector<8x4xf32>
    %2 = tpu.matmul %0, %1, %cst {dimension_numbers = #tpu.dot_dimension_numbers<[1], [0], [0], [1], [0, 0, 1, 1], [], []>, precision = #tpu.contract_precision<fp32>} : vector<8x300xf32>, vector<300x4xf32>, vector<8x4xf32> -> vector<8x4xf32>
    %3 = tpu.transpose %2, [1, 0] : vector<8x4xf32> -> vector<4x8xf32>
    %cst_3 = arith.constant dense<0xFF800000> : vector<8xf32>
    %4 = vector.multi_reduction <maximumf>, %3, %cst_3 [0] : vector<4x8xf32> to vector<8xf32>
    %5 = vector.shape_cast %4 : vector<8xf32> to vector<1x8xf32>
    %6 = vector.broadcast %5 : vector<1x8xf32> to vector<4x8xf32>
    %7 = arith.subf %3, %6 : vector<4x8xf32>
    %8 = math.exp %7 : vector<4x8xf32>
    %cst_4 = arith.constant dense<0.000000e+00> : vector<8xf32>
    %9 = vector.multi_reduction <add>, %8, %cst_4 [0] : vector<4x8xf32> to vector<8xf32>
    %10 = vector.shape_cast %9 : vector<8xf32> to vector<1x8xf32>
    %11 = vector.broadcast %10 : vector<1x8xf32> to vector<4x8xf32>
    %12 = arith.divf %8, %11 : vector<4x8xf32>
    %c0_5 = arith.constant 0 : index
    %c0_6 = arith.constant 0 : index
    %13 = vector.load %arg3[%c0_5, %c0_6] : memref<4x8xf32, #tpu.memory_space<vmem>>, vector<4x8xf32>
    tpu.vector_store %arg3[%c0_5, %c0_6], %12 {strides = array<i32>} : memref<4x8xf32, #tpu.memory_space<vmem>>, vector<4x8xf32>,
    return
  }
  func.func @transform_0(%arg0: i32) -> (i32, i32) {
    %c0_i32 = arith.constant 0 : i32
    %c0_i32_0 = arith.constant 0 : i32
    return %arg0, %c0_i32 : i32, i32
  }
  func.func @transform_1(%arg0: i32) -> (i32, i32) {
    %c0_i32 = arith.constant 0 : i32
    %c0_i32_0 = arith.constant 0 : i32
    %c0_i32_1 = arith.constant 0 : i32
    return %c0_i32, %c0_i32_0 : i32, i32
  }
  func.func @transform_2(%arg0: i32) -> (i32, i32) {
    %c0_i32 = arith.constant 0 : i32
    %c0_i32_0 = arith.constant 0 : i32
    return %c0_i32, %arg0 : i32, i32
  }
}

</mosaic_0001>

<bundles_post_ra>
// kernel: tpu_custom_call.1
= control target key start
LH: loop header
LB: loop body
LE: loop exit
PB: predicated region body
PF: predicated region fallthrough
CT: control target
= control target key end

     0   :  { %s2774_s0 = inlined_call_operand.vmem [shape: f32[8,300], index: 0, kind: input, shape index: {}]   ;;  %s2775_s1 = inlined_call_operand.vmem [shape: f32[300,4], index: 1, kind: input, shape index: {}]   ;;  %s2776_s2 = inlined_call_operand.hbm [shape: f32[4,8], index: 2, kind: output, shape index: {}]  }
   0x1   :  { %v46_v0 = vld [vmem:[%s2775_s1 + $0xf8] sm:$0xff]  ;;  %v45_v2 = vld [vmem:[%s2775_s1 + $0xf0] sm:$0xff]  ;;  %v44_v7 = vld [vmem:[%s2775_s1 + $0xe8] sm:$0xff] }
   0x2   :  { %v30_v1 = vld [vmem:[%s2775_s1 + $0x78] sm:$0xff]  ;;  %v1899_v3 = vand.u32 4294901760, %v46_v0  ;;  %v1903_v5 = vand.u32 4294901760, %v45_v2  ;;  %v29_v6 = vld [vmem:[%s2775_s1 + $0x70] sm:$0xff]  ;;  %v28_v8 = vld [vmem:[%s2775_s1 + $0x68] sm:$0xff]  ;;  %v1916_v10 = vand.u32 4294901760, %v44_v7 }
   0x3   :  { %v1901_v4 = vand.u32 4294901760, %v30_v1  ;;  %v1914_v9 = vand.u32 4294901760, %v29_v6  ;;  %v1918_v11 = vand.u32 4294901760, %v28_v8  ;;  %v43_v12 = vld [vmem:[%s2775_s1 + $0xe0] sm:$0xff]  ;;  %v42_v14 = vld [vmem:[%s2775_s1 + $0xd8] sm:$0xff]  ;;  %v1947_v20 = vld [vmem:[%s2775_s1 + $0xd0] sm:$0xff] }
   0x4   :  { %v27_v13 = vld [vmem:[%s2775_s1 + $0x60] sm:$0xff]  ;;  %1501 = vmatprep.subr.mxu0 %v1899_v3  ;;  %v1930_v15 = vand.u32 4294901760, %v43_v12  ;;  %v1934_v17 = vand.u32 4294901760, %v42_v14  ;;  %v1937_v18 = vsub.f32 %v46_v0, %v1899_v3  ;;  %v1942_v19 = vld [vmem:[%s2775_s1 + $0x58] sm:$0xff]  ;;  %v1952_v21 = vld [vmem:[%s2775_s1 + $0x50] sm:$0xff]  ;;  %v1962_v24 = vand.u32 4294901760, %v1947_v20 }
   0x5   :  { %v1932_v16 = vand.u32 4294901760, %v27_v13  ;;  %1502 = vmatpush3.msra.mxu0 %v1901_v4  ;;  %v1956_v22 = vand.u32 4294901760, %v1942_v19  ;;  %v1959_v23 = vsub.f32 %v30_v1, %v1901_v4  ;;  %v1965_v25 = vsub.f32 %v45_v2, %v1903_v5  ;;  %v1970_v26 = vld [vmem:[%s2775_s1 + $0xc8] sm:$0xff]  ;;  %v1980_v28 = vld [vmem:[%s2775_s1 + $0xc0] sm:$0xff]  ;;  %v2032_v46 = vld [vmem:[%s2775_s1 + $0xb8] sm:$0xff] }
   0x6   :  { %v1975_v27 = vld [vmem:[%s2775_s1 + $0x48] sm:$0xff]  ;;  %1503 = vmatprep.subr.mxu0 %v1903_v5  ;;  %v2790_v29 = vand.u32 4294901760, %v1937_v18  ;;  %v1985_v30 = vand.u32 4294901760, %v1952_v21  ;;  %v1988_v31 = vsub.f32 %v29_v6, %v1914_v9  ;;  %v1991_v32 = vand.u32 4294901760, %v1970_v26  ;;  %v2005_v37 = vld [vmem:[%s2775_s1 + $0x40] sm:$0xff]  ;;  %v2045_v51 = vld [vmem:[%s2775_s1 + $0x38] sm:$0xff] }
   0x7   :  { %1504 = vmatpush3.msra.mxu0 %v1914_v9  ;;  %v2789_v33 = vand.u32 4294901760, %v1959_v23  ;;  %v2787_v34 = vand.u32 4294901760, %v1965_v25  ;;  %v1997_v35 = vsub.f32 %v44_v7, %v1916_v10  ;;  %v2000_v36 = vand.u32 4294901760, %v1975_v27  ;;  %v2055_v56 = vld [vmem:[%s2775_s1 + $0xb0] sm:$0xff]  ;;  %v2085_v2 = vld [vmem:[%s2775_s1 + $0xa8] sm:$0xff] }
   0x8   :  { %2846 = vst [vmem:[#allocation5_spill] sm:$0xff] %v1985_v30  ;;  %2847 = vst [vmem:[#allocation6_spill] sm:$0xff] %v1991_v32  ;;  %1505 = vmatprep.subr.mxu0 %v1916_v10  ;;  %v289_v38 = vsub.f32 %v1937_v18, %v2790_v29  ;;  %v2786_v39 = vand.u32 4294901760, %v1988_v31  ;;  %v2013_v40 = vsub.f32 %v28_v8, %v1918_v11  ;;  %v2016_v41 = vand.u32 4294901760, %v1980_v28  ;;  %v2070_v61 = vld [vmem:[%s2775_s1 + $0x30] sm:$0xff] }
   0x9   :  { %2848 = vst [vmem:[#allocation7_spill] sm:$0xff] %v2000_v36  ;;  %1506 = vmatpush3.msra.mxu0 %v1918_v11  ;;  %v177_v42 = vsub.f32 %v1959_v23, %v2789_v33  ;;  %v296_v43 = vsub.f32 %v1965_v25, %v2787_v34  ;;  %v2784_v44 = vand.u32 4294901760, %v1997_v35  ;;  %v2027_v45 = vsub.f32 %v43_v12, %v1930_v15 }
   0xa   :  { %2849 = vst [vmem:[#allocation8_spill] sm:$0xff] %v2016_v41  ;;  %1507 = vmatprep.subr.mxu0 %v1930_v15  ;;  %v290_v47 = vand.u32 4294901760, %v289_v38  ;;  %v184_v48 = vsub.f32 %v1988_v31, %v2786_v39  ;;  %v2782_v49 = vand.u32 4294901760, %v2013_v40  ;;  %v2040_v50 = vand.u32 4294901760, %v2005_v37 }
   0xb   :  { %1508 = vmatpush3.msra.mxu0 %v1932_v16  ;;  %v178_v52 = vand.u32 4294901760, %v177_v42  ;;  %v297_v53 = vand.u32 4294901760, %v296_v43  ;;  %v303_v54 = vsub.f32 %v1997_v35, %v2784_v44  ;;  %v2781_v55 = vand.u32 4294901760, %v2027_v45 }
   0xc   :  { %2850 = vst [vmem:[#allocation9_spill] sm:$0xff] %v2040_v50  ;;  %1509 = vmatprep.subr.mxu0 %v1934_v17  ;;  %1536 = vmatprep.subr.mxu1 %v290_v47  ;;  %v185_v57 = vand.u32 4294901760, %v184_v48  ;;  %v191_v58 = vsub.f32 %v2013_v40, %v2782_v49  ;;  %v2062_v59 = vsub.f32 %v27_v13, %v1932_v16  ;;  %v2065_v60 = vand.u32 4294901760, %v2032_v46  ;;  %v2099_v13 = vld [vmem:[%s2775_s1 + $0x28] sm:$0xff] }
   0xd   :  { %1510 = vmatpush3.msra.mxu0 %v1956_v22  ;;  %1537 = vmatpush3.msra.mxu1 %v178_v52  ;;  %v304_v62 = vand.u32 4294901760, %v303_v54  ;;  %v310_v63 = vsub.f32 %v2027_v45, %v2781_v55  ;;  %v2077_v0 = vsub.f32 %v42_v14, %v1934_v17  ;;  %v2080_v1 = vand.u32 4294901760, %v2045_v51 }
   0xe   :  { %2851 = vst [vmem:[#allocation10_spill] sm:$0xff] %v2065_v60  ;;  %1511 = vmatprep.subr.mxu0 %v1962_v24  ;;  %1538 = vmatprep.subr.mxu1 %v297_v53  ;;  %v192_v6 = vand.u32 4294901760, %v191_v58  ;;  %v2779_v7 = vand.u32 4294901760, %v2062_v59  ;;  %v2091_v8 = vsub.f32 %v1942_v19, %v1956_v22  ;;  %v2094_v12 = vand.u32 4294901760, %v2055_v56 }
   0xf   :  { %2852 = vst [vmem:[#allocation11_spill] sm:$0xff] %v2080_v1  ;;  %1512 = vmatpush3.msra.mxu0 %v1985_v30  ;;  %1539 = vmatpush3.msra.mxu1 %v185_v57  ;;  %v311_v14 = vand.u32 4294901760, %v310_v63  ;;  %v2777_v38 = vand.u32 4294901760, %v2077_v0  ;;  %v2105_v42 = vsub.f32 %v1947_v20, %v1962_v24  ;;  %v2108_v19 = vand.u32 4294901760, %v2070_v61 }
  0x10   :  { %2853 = vst [vmem:[#allocation12_spill] sm:$0xff] %v2094_v12 }
  0x11   :  { %2854 = vst [vmem:[#allocation13_spill] sm:$0xff] %v2108_v19 }
  0x12   :  { %7 = vsyncpa [#allocation3], 0  ;;  %1513 = vmatprep.subr.mxu0 %v1991_v32  ;;  %1540 = vmatprep.subr.mxu1 %v304_v62  ;;  %v198_v43 = vsub.f32 %v2062_v59, %v2779_v7  ;;  %v2778_v47 = vand.u32 4294901760, %v2091_v8  ;;  %v2117_v48 = vsub.f32 %v1952_v21, %v1985_v30  ;;  %v2120_v20 = vand.u32 4294901760, %v2085_v2  ;;  %v2125_v52 = vld [vmem:[%s2775_s1 + $0xa0] sm:$0xff]  ;;  %v2178_v49 = vld [vmem:[%s2775_s1 + $0x18] sm:$0xff] }
  0x13   :  { %1514 = vmatpush3.msra.mxu0 %v2000_v36  ;;  %1541 = vmatpush3.msra.mxu1 %v192_v6  ;;  %v317_v53 = vsub.f32 %v2077_v0, %v2777_v38  ;;  %v2780_v54 = vand.u32 4294901760, %v2105_v42  ;;  %v2134_v21 = vsub.f32 %v1970_v26, %v1991_v32  ;;  %v2137_v57 = vand.u32 4294901760, %v2099_v13  ;;  %v2151_v26 = vld [vmem:[%s2775_s1 + $0x20] sm:$0xff]  ;;  %v2194_v44 = vld [vmem:[%s2775_s1 + $0x90] sm:$0xff]  ;;  %v2221_v33 = vld [vmem:[%s2775_s1 + $0x88] sm:$0xff] }
  0x14   :  { %2855 = vst [vmem:[#allocation14_spill] sm:$0xff] %v2120_v20  ;;  %1515 = vmatprep.subr.mxu0 %v2016_v41  ;;  %1542 = vmatprep.subr.mxu1 %v311_v14  ;;  %v199_v58 = vand.u32 4294901760, %v198_v43  ;;  %v205_v62 = vsub.f32 %v2091_v8, %v2778_v47  ;;  %v2783_v63 = vand.u32 4294901760, %v2117_v48  ;;  %v2146_v6 = vsub.f32 %v1975_v27, %v2000_v36  ;;  %v2164_v27 = vld [vmem:[%s2775_s1 + $0x98] sm:$0xff] }
  0x15   :  { %2856 = vst [vmem:[#allocation15_spill] sm:$0xff] %v2137_v57  ;;  %1516 = vmatpush3.msra.mxu0 %v2040_v50  ;;  %v318_v38 = vand.u32 4294901760, %v317_v53  ;;  %v324_v14 = vsub.f32 %v2105_v42, %v2780_v54  ;;  %v2785_v43 = vand.u32 4294901760, %v2134_v21  ;;  %v2159_v47 = vand.u32 4294901760, %v2125_v52 }
  0x16   :  { %1543 = vmatpush3.msra.mxu1 %v199_v58  ;;  %1517 = vmatprep.subr.mxu0 %v2065_v60  ;;  %v206_v7 = vand.u32 4294901760, %v205_v62  ;;  %v212_v53 = vsub.f32 %v2117_v48, %v2783_v63  ;;  %v2788_v54 = vand.u32 4294901760, %v2146_v6  ;;  %v2173_v55 = vsub.f32 %v1980_v28, %v2016_v41  ;;  %v12_v41 = vld [vmem:[%s2774_s0] sm:$0xff] }
  0x17   :  { %2857 = vst [vmem:[#allocation16_spill] sm:$0xff] %v2159_v47  ;;  %1544 = vmatprep.subr.mxu1 %v318_v38  ;;  %1518 = vmatpush3.msra.mxu0 %v2080_v1  ;;  %v325_v58 = vand.u32 4294901760, %v324_v14  ;;  %v331_v62 = vsub.f32 %v2134_v21, %v2785_v43  ;;  %v2185_v63 = vand.u32 4294901760, %v2151_v26  ;;  %v2189_v28 = vsub.f32 %v2005_v37, %v2040_v50  ;;  %v2207_v37 = vld [vmem:[%s2775_s1 + $0x10] sm:$0xff] }
  0x18   :  { %1545 = vmatpush3.msra.mxu1 %v206_v7  ;;  %1519 = vmatprep.subr.mxu0 %v2094_v12  ;;  %v213_v38 = vand.u32 4294901760, %v212_v53  ;;  %v219_v14 = vsub.f32 %v2146_v6, %v2788_v54  ;;  %v2793_v43 = vand.u32 4294901760, %v2173_v55  ;;  %v2202_v39 = vand.u32 4294901760, %v2164_v27 }
  0x19   :  { %2858 = vst [vmem:[#allocation17_spill] sm:$0xff] %v2185_v63  ;;  %1546 = vmatprep.subr.mxu1 %v325_v58  ;;  %1520 = vmatpush3.msra.mxu0 %v2108_v19  ;;  %v332_v7 = vand.u32 4294901760, %v331_v62  ;;  %v2794_v53 = vand.u32 4294901760, %v2189_v28  ;;  %v2213_v34 = vsub.f32 %v2032_v46, %v2065_v60  ;;  %v2216_v54 = vand.u32 4294901760, %v2178_v49 }
  0x1a   :  { %1547 = vmatpush3.msra.mxu1 %v213_v38  ;;  %1521 = vmatprep.subr.mxu0 %v2120_v20  ;;  %v220_v58 = vand.u32 4294901760, %v219_v14  ;;  %v338_v62 = vsub.f32 %v2173_v55, %v2793_v43  ;;  %v2229_v46 = vsub.f32 %v2045_v51, %v2080_v1  ;;  %v2232_v29 = vand.u32 4294901760, %v2194_v44  ;;  %v2249_v51 = vld [vmem:[%s2775_s1 + $0x8] sm:$0xff] }
  0x1b   :  { %2859 = vst [vmem:[#allocation18_spill] sm:$0xff] %v2216_v54  ;;  %1548 = vmatprep.subr.mxu1 %v332_v7  ;;  %1522 = vmatpush3.msra.mxu0 %v2137_v57  ;;  %v226_v38 = vsub.f32 %v2189_v28, %v2794_v53  ;;  %v2241_v60 = vsub.f32 %v2055_v56, %v2094_v12  ;;  %v2244_v43 = vand.u32 4294901760, %v2207_v37  ;;  %v2258_v56 = vand.u32 4294901760, %v2221_v33  ;;  %v2263_v12 = vld [vmem:[%s2775_s1 + $0x80] sm:$0xff] }
  0x1c   :  { %2860 = vst [vmem:[#allocation19_spill] sm:$0xff] %v2232_v29  ;;  %1549 = vmatpush3.msra.mxu1 %v220_v58  ;;  %1523 = vmatprep.subr.mxu0 %v2159_v47  ;;  %v339_v7 = vand.u32 4294901760, %v338_v62  ;;  %v2255_v14 = vsub.f32 %v2070_v61, %v2108_v19  ;;  %v2864_v1 = vand.u32 4294901760, %v2213_v34  ;;  %v2272_v61 = vsub.f32 %v2085_v2, %v2120_v20  ;;  %v2289_v2 = vld [vmem:[%s2775_s1] sm:$0xff] }
  0x1d   :  { %2861 = vst [vmem:[#allocation20_spill] sm:$0xff] %v2244_v43  ;;  %2863 = vst [vmem:[#allocation22_spill] sm:$0xff] %v2258_v56  ;;  %1524 = vmatpush3.msra.mxu0 %v2185_v63  ;;  %v227_v58 = vand.u32 4294901760, %v226_v38  ;;  %v2811_v53 = vand.u32 4294901760, %v2241_v60  ;;  %v2866_v19 = vand.u32 4294901760, %v2229_v46  ;;  %v2280_v38 = vand.u32 4294901760, %v2249_v51 }
  0x1e   :  { %2862 = vst [vmem:[#allocation21_spill] sm:$0xff] %v2255_v14  ;;  %v345_v62 = vsub.f32 %v2213_v34, %v2864_v1  ;;  %2865 = vst [vmem:[#allocation23_spill] sm:$0xff] %v2272_v61  ;;  %1550 = vmatprep.subr.mxu1 %v339_v7  ;;  %1525 = vmatprep.subr.mxu0 %v2202_v39  ;;  %v2284_v1 = vsub.f32 %v2099_v13, %v2137_v57  ;;  %v2297_v20 = vand.u32 4294901760, %v2263_v12  ;;  %v13_v13 = vld [vmem:[%s2774_s0 + $0x8] sm:$0xff]  ;;  %vm57_vm0 = vcmask 1043456  }
  0x1f   :  { %v233_v50 = vsub.f32 %v2229_v46, %v2866_v19  ;;  %1551 = vmatpush3.msra.mxu1 %v227_v58  ;;  %1526 = vmatpush3.msra.mxu0 %v2216_v54  ;;  %v352_v19 = vsub.f32 %v2241_v60, %v2811_v53  ;;  %v2867_v58 = vand.u32 4294901760, %v2255_v14  ;;  %v2309_v53 = vsub.f32 %v2125_v52, %v2159_v47 }
  0x20   :  { %v346_v7 = vand.u32 4294901760, %v345_v62  ;;  %1527 = vmatprep.subr.mxu0 %v2232_v29  ;;  %v2323_v36 = vsub.f32 %v2151_v26, %v2185_v63  ;;  %v2338_v26 = vand.u32 4294901760, %v12_v41  ;;  %vm53_vm1 = vcmask 359424  }
  0x21   :  { %v234_v57 = vand.u32 4294901760, %v233_v50  ;;  %v240_v62 = vsub.f32 %v2255_v14, %v2867_v58  ;;  %v353_v32 = vand.u32 4294901760, %v352_v19  ;;  %1528 = vmatpush3.msra.mxu0 %v2244_v43  ;;  %v2868_v50 = vand.u32 4294901760, %v2272_v61 }
  0x22   :  { %1552 = vmatprep.subr.mxu1 %v346_v7  ;;  %v2319_v58 = vand.u32 4294901760, %v2289_v2  ;;  %1529 = vmatprep.subr.mxu0 %v2258_v56  ;;  %v2869_v7 = vand.u32 4294901760, %v2284_v1  ;;  %v2822_v47 = vand.u32 4294901760, %v2309_v53  ;;  %v2330_v14 = vand.u32 4294901760, %v13_v13  ;;  %2871 = vst [vmem:[#allocation25_spill] sm:$0xff] %v2338_v26 }
  0x23   :  { %v359_v30 = vsub.f32 %v2272_v61, %v2868_v50  ;;  %1553 = vmatpush3.msra.mxu1 %v234_v57  ;;  %v241_v52 = vand.u32 4294901760, %v240_v62  ;;  %1530 = vmatpush3.msra.mxu0 %v2280_v38  ;;  %v2823_v61 = vand.u32 4294901760, %v2323_v36  ;;  %v2336_v57 = vsub.f32 %v2164_v27, %v2202_v39 }
  0x24   :  { %v247_v19 = vsub.f32 %v2284_v1, %v2869_v7  ;;  %2870 = vst [vmem:[#allocation24_spill] sm:$0xff] %v2330_v14  ;;  %1554 = vmatprep.subr.mxu1 %v353_v32  ;;  %1531 = vmatprep.subr.mxu0 %v2297_v20  ;;  %v366_v7 = vsub.f32 %v2309_v53, %v2822_v47  ;;  %vm1873_vm2 = vmmov 0   ;;  %vm1466_vm3 = vcmask 60416  }
  0x25   :  { %v360_v50 = vand.u32 4294901760, %v359_v30  ;;  %1555 = vmatpush3.msra.mxu1 %v241_v52  ;;  %v2345_v30 = vsub.f32 %v13_v13, %v2330_v14  ;;  %v2349_v32 = vsub.f32 %v2178_v49, %v2216_v54  ;;  %1532 = vmatpush3.msra.mxu0 %v2319_v58  ;;  %v254_v27 = vsub.f32 %v2323_v36, %v2823_v61 }
  0x26   :  { %v248_v62 = vand.u32 4294901760, %v247_v19  ;;  %v2357_v19 = vsub.f32 %v12_v41, %v2338_v26  ;;  %v2361_v13 = vsub.f32 %v2194_v44, %v2232_v29  ;;  %v367_v47 = vand.u32 4294901760, %v366_v7  ;;  %1571 = vmatprep.subr.mxu0 %v1937_v18  ;;  %398 = vmatprep.mubr.f32.mxu1 %v2330_v14 }
  0x27   :  { %1556 = vmatprep.subr.mxu1 %v360_v50  ;;  %v2828_v49 = vand.u32 4294901760, %v2345_v30  ;;  %v2831_v50 = vand.u32 4294901760, %v2349_v32  ;;  %v2368_v61 = vsub.f32 %v2207_v37, %v2244_v43  ;;  %v255_v52 = vand.u32 4294901760, %v254_v27 }
  0x28   :  { %1557 = vmatpush3.msra.mxu1 %v248_v62  ;;  %v2872_v41 = vand.u32 4294901760, %v2336_v57  ;;  %v2873_v62 = vand.u32 4294901760, %v2357_v19  ;;  %v2874_v14 = vand.u32 4294901760, %v2361_v13  ;;  %v2395_v43 = vsub.f32 %v2249_v51, %v2280_v38 }
  0x29   :  { %1558 = vmatprep.subr.mxu1 %v367_v47  ;;  %v160_v7 = vsub.f32 %v2345_v30, %v2828_v49  ;;  %v261_v37 = vsub.f32 %v2349_v32, %v2831_v50  ;;  %v2876_v29 = vand.u32 4294901760, %v2368_v61 }
  0x2a   :  { %v373_v54 = vsub.f32 %v2336_v57, %v2872_v41  ;;  %v2385_v41 = vsub.f32 %v2221_v33, %v2258_v56  ;;  %1559 = vmatpush3.msra.mxu1 %v255_v52  ;;  %v166_v47 = vsub.f32 %v2357_v19, %v2873_v62  ;;  %v380_v49 = vsub.f32 %v2361_v13, %v2874_v14 }
  0x2b   :  { %2875 = vst [vmem:[#allocation26_spill] sm:$0xff] %v2395_v43  ;;  %v161_v50 = vand.u32 4294901760, %v160_v7  ;;  %v262_v27 = vand.u32 4294901760, %v261_v37  ;;  %v268_v33 = vsub.f32 %v2368_v61, %v2876_v29  ;;  %v2838_v62 = vand.u32 4294901760, %v2395_v43 }
  0x2c   :  { %v374_v44 = vand.u32 4294901760, %v373_v54  ;;  %v2839_v54 = vand.u32 4294901760, %v2385_v41  ;;  %v167_v52 = vand.u32 4294901760, %v166_v47  ;;  %v381_v56 = vand.u32 4294901760, %v380_v49 }
  0x2d   :  { %v2404_v14 = vsub.f32 %v2263_v12, %v2297_v20  ;;  %162 = vmatprep.mubr.f32.mxu0 %v161_v50  ;;  %v269_v51 = vand.u32 4294901760, %v268_v33  ;;  %v2411_v29 = vsub.f32 %v2289_v2, %v2319_v58  ;;  %v275_v49 = vsub.f32 %v2395_v43, %v2838_v62  ;;  %v2879_v33 = vld [vmem:[#allocation21_spill] sm:$0xff]  ;;  %v2892_v62 = vld [vmem:[#allocation16_spill] sm:$0xff] }
  0x2e   :  { %1560 = vmatprep.subr.mxu1 %v374_v44  ;;  %v387_v7 = vsub.f32 %v2385_v41, %v2839_v54  ;;  %168 = vmatmul.mubr.f32.vlgmr.msra.gmra.mxu0 %v167_v52  ;;  %v2880_v52 = vld [vmem:[#allocation5_spill] sm:$0xff]  ;;  %v2893_v54 = vand.u32 4294901760, %v1937_v18  ;;  %v2901_v18 = vand.u32 4294901760, %v1997_v35 }
  0x2f   :  { %2877 = vst [vmem:[#allocation27_spill] sm:$0xff] %v2404_v14  ;;  %1561 = vmatpush3.msra.mxu1 %v262_v27  ;;  %2878 = vst [vmem:[#allocation28_spill] sm:$0xff] %v2411_v29  ;;  %v2837_v12 = vand.u32 4294901760, %v2404_v14  ;;  %1572 = vmatpush3.msra.mxu0 %v1959_v23  ;;  %v2836_v44 = vand.u32 4294901760, %v2411_v29  ;;  %v276_v37 = vand.u32 4294901760, %v275_v49  ;;  %v2883_v49 = vld [vmem:[#allocation7_spill] sm:$0xff] }
  0x30   :  { %1562 = vmatprep.subr.mxu1 %v381_v56  ;;  %v388_v50 = vand.u32 4294901760, %v387_v7  ;;  %1573 = vmatprep.subr.mxu0 %v1965_v25  ;;  %v2882_v7 = vld [vmem:[#allocation6_spill] sm:$0xff] }
  0x31   :  { %1563 = vmatpush3.msra.mxu1 %v269_v51  ;;  %v394_v2 = vsub.f32 %v2404_v14, %v2837_v12  ;;  %535 = vmatprep.mubr.f32.mxu0 %v2345_v30  ;;  %v282_v56 = vsub.f32 %v2411_v29, %v2836_v44  ;;  %v2881_v51 = vld [vmem:[#allocation23_spill] sm:$0xff]  ;;  %v2890_v44 = vld [vmem:[#allocation14_spill] sm:$0xff] }
  0x32   :  { %1574 = vmatpush3.msra.mxu0 %v1988_v31  ;;  %1564 = vmatprep.subr.mxu1 %v388_v50  ;;  %v2884_v50 = vld [vmem:[#allocation8_spill] sm:$0xff]  ;;  %v2891_v12 = vld [vmem:[#allocation15_spill] sm:$0xff] }
  0x33   :  { %1575 = vmatprep.subr.mxu0 %v1997_v35  ;;  %1565 = vmatpush3.msra.mxu1 %v276_v37  ;;  %v395_v27 = vand.u32 4294901760, %v394_v2  ;;  %v283_v47 = vand.u32 4294901760, %v282_v56  ;;  %v2885_v37 = vld [vmem:[#allocation9_spill] sm:$0xff]  ;;  %v2886_v2 = vld [vmem:[#allocation10_spill] sm:$0xff]  ;;  %v2887_v56 = vld [vmem:[#allocation11_spill] sm:$0xff]  ;;  %v2906_v35 = vand.u32 4294901760, %v2357_v19 }
  0x34   :  { %1576 = vmatpush3.msra.mxu0 %v2013_v40 }
  0x35   :  { %1566 = vmatprep.subr.mxu1 %v395_v27  ;;  %1577 = vmatprep.subr.mxu0 %v2027_v45  ;;  %v2888_v27 = vld [vmem:[#allocation12_spill] sm:$0xff] }
  0x36   :  { %1567 = vmatpush3.msra.mxu1 %v283_v47  ;;  %1578 = vmatpush3.msra.mxu0 %v2062_v59  ;;  %v2889_v47 = vld [vmem:[#allocation13_spill] sm:$0xff] }
  0x37   :  { %400 = vmatmul.mubr.f32.vlgmr.msra.gmra.mxu1 %v2338_v26  ;;  %1579 = vmatprep.subr.mxu0 %v2077_v0  ;;  %v2894_v26 = vld [vmem:[#allocation18_spill] sm:$0xff] }
  0x38   :  { %1606 = vmatprep.subr.mxu1 %v1899_v3  ;;  %1580 = vmatpush3.msra.mxu0 %v2091_v8 }
  0x39   :  { %1607 = vmatpush3.msra.mxu1 %v1901_v4  ;;  %1581 = vmatprep.subr.mxu0 %v2105_v42 }
  0x3a   :  { %1608 = vmatprep.subr.mxu1 %v1903_v5  ;;  %1582 = vmatpush3.msra.mxu0 %v2117_v48 }
  0x3b   :  { %1609 = vmatpush3.msra.mxu1 %v1914_v9  ;;  %1583 = vmatprep.subr.mxu0 %v2134_v21 }
  0x3c   :  { %1610 = vmatprep.subr.mxu1 %v1916_v10  ;;  %1584 = vmatpush3.msra.mxu0 %v2146_v6 }
  0x3d   :  { %1611 = vmatpush3.msra.mxu1 %v1918_v11  ;;  %1585 = vmatprep.subr.mxu0 %v2173_v55 }
  0x3e   :  { %1612 = vmatprep.subr.mxu1 %v1930_v15  ;;  %1586 = vmatpush3.msra.mxu0 %v2189_v28 }
  0x3f   :  { %1613 = vmatpush3.msra.mxu1 %v1932_v16  ;;  %1587 = vmatprep.subr.mxu0 %v2213_v34 }
  0x40   :  { %1614 = vmatprep.subr.mxu1 %v1934_v17  ;;  %1588 = vmatpush3.msra.mxu0 %v2229_v46 }
  0x41   :  { %1615 = vmatpush3.msra.mxu1 %v1956_v22  ;;  %1589 = vmatprep.subr.mxu0 %v2241_v60 }
  0x42   :  { %1616 = vmatprep.subr.mxu1 %v1962_v24  ;;  %1590 = vmatpush3.msra.mxu0 %v2879_v33 }
  0x43   :  { %1617 = vmatpush3.msra.mxu1 %v2880_v52  ;;  %1591 = vmatprep.subr.mxu0 %v2881_v51 }
  0x44   :  { %1618 = vmatprep.subr.mxu1 %v2882_v7  ;;  %1592 = vmatpush3.msra.mxu0 %v2284_v1 }
  0x45   :  { %1619 = vmatpush3.msra.mxu1 %v2883_v49  ;;  %1593 = vmatprep.subr.mxu0 %v2309_v53 }
  0x46   :  { %1620 = vmatprep.subr.mxu1 %v2884_v50  ;;  %1594 = vmatpush3.msra.mxu0 %v2323_v36 }
  0x47   :  { %1621 = vmatpush3.msra.mxu1 %v2885_v37  ;;  %1595 = vmatprep.subr.mxu0 %v2336_v57 }
  0x48   :  { %1622 = vmatprep.subr.mxu1 %v2886_v2  ;;  %1596 = vmatpush3.msra.mxu0 %v2349_v32 }
  0x49   :  { %1623 = vmatpush3.msra.mxu1 %v2887_v56  ;;  %1597 = vmatprep.subr.mxu0 %v2361_v13 }
  0x4a   :  { %1624 = vmatprep.subr.mxu1 %v2888_v27  ;;  %1598 = vmatpush3.msra.mxu0 %v2368_v61 }
  0x4b   :  { %1625 = vmatpush3.msra.mxu1 %v2889_v47  ;;  %1599 = vmatprep.subr.mxu0 %v2385_v41 }
  0x4c   :  { %1626 = vmatprep.subr.mxu1 %v2890_v44  ;;  %1600 = vmatpush3.msra.mxu0 %v2395_v43  ;;  %v2895_v43 = vand.u32 4294901760, %v1959_v23  ;;  %v2902_v23 = vand.u32 4294901760, %v2013_v40  ;;  %v2908_v40 = vand.u32 4294901760, %v2091_v8  ;;  %v2922_v8 = vand.u32 4294901760, %v2323_v36  ;;  %v50_v36 = vld [vmem:[%s2775_s1 + $0x118] sm:$0xff] }
  0x4d   :  { %1627 = vmatpush3.msra.mxu1 %v2891_v12  ;;  %1601 = vmatprep.subr.mxu0 %v2404_v14  ;;  %v2896_v12 = vld [vmem:[#allocation19_spill] sm:$0xff]  ;;  %v2900_v14 = vld [vmem:[#allocation22_spill] sm:$0xff] }
  0x4e   :  { %1628 = vmatprep.subr.mxu1 %v2892_v62  ;;  %1602 = vmatpush3.msra.mxu0 %v2411_v29  ;;  %v2897_v62 = vand.u32 4294901760, %v1965_v25  ;;  %v2898_v29 = vld [vmem:[#allocation20_spill] sm:$0xff]  ;;  %v2903_v25 = vand.u32 4294901760, %v2027_v45  ;;  %v2909_v45 = vand.u32 4294901760, %v2105_v42 }
  0x4f   :  { %1629 = vmatpush3.msra.mxu1 %v2185_v63  ;;  %538 = vmatmul.mubr.f32.vlgmr.msra.gmra.mxu0 %v2357_v19  ;;  %v2899_v63 = vand.u32 4294901760, %v1988_v31  ;;  %v2904_v31 = vand.u32 4294901760, %v2345_v30  ;;  %v2597_v19 = vand.u32 4294901760, %v50_v36 }
  0x50   :  { %1630 = vmatprep.subr.mxu1 %v2202_v39  ;;  %1641 = vmatprep.subr.mxu0 %v2893_v54  ;;  %v2930_v54 = vld [vmem:[#allocation15_spill] sm:$0xff] }
  0x51   :  { %1631 = vmatpush3.msra.mxu1 %v2894_v26  ;;  %1642 = vmatpush3.msra.mxu0 %v2895_v43  ;;  %v2907_v43 = vand.u32 4294901760, %v2077_v0  ;;  %v2911_v0 = vand.u32 4294901760, %v2134_v21 }
  0x52   :  { %1632 = vmatprep.subr.mxu1 %v2896_v12  ;;  %1643 = vmatprep.subr.mxu0 %v2897_v62 }
  0x53   :  { %1633 = vmatpush3.msra.mxu1 %v2898_v29  ;;  %1644 = vmatpush3.msra.mxu0 %v2899_v63  ;;  %v2905_v63 = vand.u32 4294901760, %v2062_v59  ;;  %v2910_v59 = vand.u32 4294901760, %v2117_v48  ;;  %v2923_v48 = vand.u32 4294901760, %v2336_v57  ;;  %v49_v57 = vld [vmem:[%s2775_s1 + $0x110] sm:$0xff] }
  0x54   :  { %1634 = vmatprep.subr.mxu1 %v2900_v14  ;;  %1645 = vmatprep.subr.mxu0 %v2901_v18  ;;  %v2626_v18 = vsub.f32 %v50_v36, %v2597_v19 }
  0x55   :  { %1635 = vmatpush3.msra.mxu1 %v2280_v38  ;;  %1646 = vmatpush3.msra.mxu0 %v2902_v23 }
  0x56   :  { %1636 = vmatprep.subr.mxu1 %v2297_v20  ;;  %1647 = vmatprep.subr.mxu0 %v2903_v25  ;;  %v1872_v25 = vmov 0.0  }
  0x57   :  { %1637 = vmatpush3.msra.mxu1 %v2319_v58  ;;  %642 = vmatprep.mubr.f32.mxu1 %v2904_v31 }
  0x58   :  { %1648 = vmatpush3.msra.mxu0 %v2905_v63  ;;  %646 = vmatmul.mubr.f32.vlgmr.msra.gmra.mxu1 %v2906_v35 }
  0x59   :  { %1649 = vmatprep.subr.mxu0 %v2907_v43  ;;  %1676 = vmatprep.subr.mxu1 %v1899_v3  ;;  %v2912_v3 = vand.u32 4294901760, %v2146_v6  ;;  %v2924_v6 = vand.u32 4294901760, %v2349_v32  ;;  %v2927_v32 = vand.u32 4294901760, %v2385_v41  ;;  %v2933_v41 = vld [vmem:[#allocation16_spill] sm:$0xff] }
  0x5a   :  { %1650 = vmatpush3.msra.mxu0 %v2908_v40  ;;  %1677 = vmatpush3.msra.mxu1 %v1901_v4  ;;  %v2913_v4 = vand.u32 4294901760, %v2173_v55  ;;  %v2921_v55 = vand.u32 4294901760, %v2309_v53  ;;  %v2925_v53 = vand.u32 4294901760, %v2361_v13  ;;  %v1041_v40 = vand.u32 4294901760, %v2626_v18 }
  0x5b   :  { %1651 = vmatprep.subr.mxu0 %v2909_v45  ;;  %1678 = vmatprep.subr.mxu1 %v1903_v5  ;;  %v2914_v5 = vand.u32 4294901760, %v2189_v28 }
  0x5c   :  { %1652 = vmatpush3.msra.mxu0 %v2910_v59  ;;  %1679 = vmatpush3.msra.mxu1 %v1914_v9  ;;  %v2915_v9 = vand.u32 4294901760, %v2213_v34  ;;  %v2920_v34 = vand.u32 4294901760, %v2284_v1 }
  0x5d   :  { %1653 = vmatprep.subr.mxu0 %v2911_v0  ;;  %1680 = vmatprep.subr.mxu1 %v1916_v10  ;;  %v2916_v10 = vand.u32 4294901760, %v2229_v46  ;;  %v2926_v46 = vand.u32 4294901760, %v2368_v61  ;;  %v2928_v61 = vld [vmem:[#allocation26_spill] sm:$0xff] }
  0x5e   :  { %1654 = vmatpush3.msra.mxu0 %v2912_v3  ;;  %1681 = vmatpush3.msra.mxu1 %v1918_v11  ;;  %v52_v11 = vld [vmem:[%s2775_s1 + $0x128] sm:$0xf]  ;;  %v2929_v13 = vand.u32 4294901760, %v2928_v61 }
  0x5f   :  { %1655 = vmatprep.subr.mxu0 %v2913_v4  ;;  %1682 = vmatprep.subr.mxu1 %v1930_v15  ;;  %v2917_v15 = vand.u32 4294901760, %v2241_v60  ;;  %v51_v60 = vld [vmem:[%s2775_s1 + $0x120] sm:$0xff] }
  0x60   :  { %1656 = vmatpush3.msra.mxu0 %v2914_v5  ;;  %1683 = vmatpush3.msra.mxu1 %v1932_v16  ;;  %v2918_v16 = vand.u32 4294901760, %v2879_v33  ;;  %v2575_v28 = vand.u32 4294901760, %v51_v60  ;;  %v48_v33 = vld [vmem:[%s2775_s1 + $0x108] sm:$0xff] }
  0x61   :  { %1657 = vmatprep.subr.mxu0 %v2915_v9  ;;  %1684 = vmatprep.subr.mxu1 %v1934_v17  ;;  %v2919_v17 = vand.u32 4294901760, %v2881_v51  ;;  %v2628_v23 = vand.u32 4294901760, %v48_v33 }
  0x62   :  { %1658 = vmatpush3.msra.mxu0 %v2916_v10  ;;  %1685 = vmatpush3.msra.mxu1 %v1956_v22  ;;  %v59_v22 = vsel %vm57_vm0, %v52_v11, 0  ;;  %v2603_v62 = vsub.f32 %v51_v60, %v2575_v28 }
  0x63   :  { %1659 = vmatprep.subr.mxu0 %v2917_v15  ;;  %1686 = vmatprep.subr.mxu1 %v1962_v24  ;;  %v14_v24 = vld [vmem:[%s2774_s0 + $0x10] sm:$0xff]  ;;  %v2567_v42 = vand.u32 4294901760, %v59_v22 }
  0x64   :  { %1660 = vmatpush3.msra.mxu0 %v2918_v16  ;;  %1687 = vmatpush3.msra.mxu1 %v2880_v52  ;;  %v55_v21 = vsel %vm53_vm1, %v14_v24, 0  ;;  %v2931_v52 = vld [vmem:[#allocation27_spill] sm:$0xff]  ;;  %v1034_v31 = vand.u32 4294901760, %v2603_v62 }
  0x65   :  { %1661 = vmatprep.subr.mxu0 %v2919_v17  ;;  %1688 = vmatprep.subr.mxu1 %v2882_v7  ;;  %v2587_v1 = vsub.f32 %v59_v22, %v2567_v42  ;;  %v2592_v30 = vand.u32 4294901760, %v55_v21  ;;  %v2932_v51 = vand.u32 4294901760, %v2931_v52  ;;  %v2934_v7 = vld [vmem:[#allocation28_spill] sm:$0xff] }
  0x66   :  { %1662 = vmatpush3.msra.mxu0 %v2920_v34  ;;  %1689 = vmatpush3.msra.mxu1 %v2883_v49  ;;  %v2935_v49 = vand.u32 4294901760, %v2934_v7 }
  0x67   :  { %1663 = vmatprep.subr.mxu0 %v2921_v55  ;;  %1690 = vmatprep.subr.mxu1 %v2884_v50  ;;  %v2936_v50 = vld [vmem:[#allocation24_spill] sm:$0xff] }
  0x68   :  { %1664 = vmatpush3.msra.mxu0 %v2922_v8  ;;  %1691 = vmatpush3.msra.mxu1 %v2885_v37  ;;  %v1027_v37 = vand.u32 4294901760, %v2587_v1 }
  0x69   :  { %1665 = vmatprep.subr.mxu0 %v2923_v48  ;;  %1692 = vmatprep.subr.mxu1 %v2886_v2  ;;  %v47_v2 = vld [vmem:[%s2775_s1 + $0x100] sm:$0xff]  ;;  %s1874_s1 = smov [#allocation2]  }
  0x6a   :  { %1666 = vmatpush3.msra.mxu0 %v2924_v6  ;;  %1693 = vmatpush3.msra.mxu1 %v2887_v56  ;;  %v2621_v56 = vsub.f32 %v55_v21, %v2592_v30  ;;  %v2638_v35 = vand.u32 4294901760, %v47_v2  ;;  %s1493_s6 = sshll.u32 %s1874_s1, 4  ;;  %s1494_s6 = int_to_ptr.vmem [resolvable:$true] %s1493_s6 }
  0x6b   :  { %1667 = vmatprep.subr.mxu0 %v2925_v53  ;;  %1694 = vmatprep.subr.mxu1 %v2888_v27  ;;  %v2937_v27 = vld [vmem:[#allocation17_spill] sm:$0xff]  ;;  %s1850_s7 = scalar_lea.vmem %s1494_s6, 64  ;;  %p1855_p1 = scmp.lt.s32.totalorder %s1494_s6, %s1494_s6 }
  0x6c   :  { %1668 = vmatpush3.msra.mxu0 %v2926_v46  ;;  %1695 = vmatpush3.msra.mxu1 %v2889_v47  ;;  %v2938_v47 = vld [vmem:[#allocation25_spill] sm:$0xff]  ;;  %v996_v43 = vand.u32 4294901760, %v2621_v56  ;;  %p1851_p0 = scmp.ne.s32.totalorder %s1494_s6, %s1850_s7  ;;  %p1856_p2 = scmp.lt.s32.totalorder %s1850_s7, %s1850_s7 }
  0x6d   :  { %1669 = vmatprep.subr.mxu0 %v2927_v32  ;;  %1696 = vmatprep.subr.mxu1 %v2890_v44  ;;  %v2611_v44 = vand.u32 4294901760, %v49_v57 }
  0x6e   :  { %1670 = vmatpush3.msra.mxu0 %v2929_v13  ;;  %1697 = vmatpush3.msra.mxu1 %v2930_v54  ;;  %v997_v59 = vsub.f32 %v2621_v56, %v996_v43  ;;  %p1857_p3 = por %p1856_p2, %p1855_p1 }
  0x6f   :  { %1671 = vmatprep.subr.mxu0 %v2932_v51  ;;  %1698 = vmatprep.subr.mxu1 %v2933_v41  ;;  %v2636_v63 = vsub.f32 %v49_v57, %v2611_v44 }
  0x70   :  { %1672 = vmatpush3.msra.mxu0 %v2935_v49  ;;  %812 = vmatprep.mubr.f32.mxu0 %v2936_v50  ;;  %v998_v4 = vand.u32 4294901760, %v997_v59  ;;  %p1858_p4 = pnand %p1857_p3, %p1851_p0 }
  0x71   :  { %1699 = vmatpush3.msra.mxu1 %v2937_v27  ;;  %814 = vmatmul.mubr.f32.vlgmr.msra.gmra.mxu0 %v2938_v47  ;;  %v1048_v45 = vand.u32 4294901760, %v2636_v63 }
  0x72   :  { %1700 = vmatprep.subr.mxu1 %v2202_v39  ;;  %1753 = vmatprep.subr.mxu0 %v1872_v25  ;;  %v1028_v39 = vsub.f32 %v2587_v1, %v1027_v37 }
  0x73   :  { %1701 = vmatpush3.msra.mxu1 %v2894_v26  ;;  %1754 = vmatpush3.msra.mxu0 %v2567_v42  ;;  %v2649_v26 = vsub.f32 %v48_v33, %v2628_v23 }
  0x74   :  { %1702 = vmatprep.subr.mxu1 %v2896_v12  ;;  %1755 = vmatprep.subr.mxu0 %v1872_v25  ;;  %v1035_v12 = vsub.f32 %v2603_v62, %v1034_v31 }
  0x75   :  { %1703 = vmatpush3.msra.mxu1 %v2898_v29  ;;  %1756 = vmatpush3.msra.mxu0 %v2575_v28  ;;  %v2660_v29 = vsub.f32 %v47_v2, %v2638_v35  ;;  %v1055_v0 = vand.u32 4294901760, %v2649_v26 }
  0x76   :  { %1704 = vmatprep.subr.mxu1 %v2900_v14  ;;  %1757 = vmatprep.subr.mxu0 %v1872_v25  ;;  %v1029_v14 = vand.u32 4294901760, %v1028_v39 }
  0x77   :  { %1705 = vmatpush3.msra.mxu1 %v2280_v38  ;;  %1758 = vmatpush3.msra.mxu0 %v2597_v19  ;;  %v1042_v38 = vsub.f32 %v2626_v18, %v1041_v40  ;;  %v1062_v3 = vand.u32 4294901760, %v2660_v29  ;;  %v1056_v9 = vsub.f32 %v2649_v26, %v1055_v0 }
  0x78   :  { %1706 = vmatprep.subr.mxu1 %v2297_v20  ;;  %1759 = vmatprep.subr.mxu0 %v1872_v25  ;;  %v1036_v20 = vand.u32 4294901760, %v1035_v12 }
  0x79   :  { %1707 = vmatpush3.msra.mxu1 %v2319_v58  ;;  %916 = vmatprep.mubr.f32.mxu1 %v2936_v50  ;;  %v1049_v58 = vsub.f32 %v2636_v63, %v1048_v45  ;;  %v1043_v5 = vand.u32 4294901760, %v1042_v38  ;;  %v1063_v11 = vsub.f32 %v2660_v29, %v1062_v3  ;;  %v1057_v15 = vand.u32 4294901760, %v1056_v9 }
  0x7a   :  { %1760 = vmatpush3.msra.mxu0 %v2611_v44  ;;  %918 = vmatmul.mubr.f32.vlgmr.msra.gmra.mxu1 %v2938_v47 }
  0x7b   :  { %1761 = vmatprep.subr.mxu0 %v1872_v25  ;;  %1768 = vmatprep.subr.mxu1 %v1872_v25  ;;  %v1050_v10 = vand.u32 4294901760, %v1049_v58  ;;  %v1064_v16 = vand.u32 4294901760, %v1063_v11 }
  0x7c   :  { %1762 = vmatpush3.msra.mxu0 %v2628_v23  ;;  %1769 = vmatpush3.msra.mxu1 %v1029_v14 }
  0x7d   :  { %1763 = vmatprep.subr.mxu0 %v1872_v25  ;;  %1770 = vmatprep.subr.mxu1 %v1872_v25 }
  0x7e   :  { %1764 = vmatpush3.msra.mxu0 %v2638_v35  ;;  %1771 = vmatpush3.msra.mxu1 %v1036_v20 }
  0x7f   :  { %1765 = vmatprep.mubr.msk.f32.mxu0 %vm1873_vm2, %v1872_v25  ;;  %1772 = vmatprep.subr.mxu1 %v1872_v25 }
  0x80   :  { %1783 = vmatprep.subr.mxu0 %v1872_v25  ;;  %1766 = vmatmul.mubr.f32.vlgmr.msra.gmra.mxu0 %v998_v4 }
  0x81   :  { %1773 = vmatpush3.msra.mxu1 %v1043_v5  ;;  %1784 = vmatpush3.msra.mxu0 %v2587_v1 }
  0x82   :  { %1774 = vmatprep.subr.mxu1 %v1872_v25  ;;  %1785 = vmatprep.subr.mxu0 %v1872_v25 }
  0x83   :  { %1775 = vmatpush3.msra.mxu1 %v1050_v10  ;;  %1786 = vmatpush3.msra.mxu0 %v2603_v62 }
  0x84   :  { %1776 = vmatprep.subr.mxu1 %v1872_v25  ;;  %1787 = vmatprep.subr.mxu0 %v1872_v25 }
  0x85   :  { %1777 = vmatpush3.msra.mxu1 %v1057_v15  ;;  %1788 = vmatpush3.msra.mxu0 %v2626_v18 }
  0x86   :  { %1778 = vmatprep.subr.mxu1 %v1872_v25  ;;  %1789 = vmatprep.subr.mxu0 %v1872_v25 }
  0x87   :  { %1779 = vmatpush3.msra.mxu1 %v1064_v16  ;;  %1780 = vmatprep.mubr.msk.f32.mxu1 %vm1873_vm2, %v1872_v25 }
  0x88   :  { %1790 = vmatpush3.msra.mxu0 %v2636_v63  ;;  %1781 = vmatmul.mubr.f32.vlgmr.msra.gmra.mxu1 %v2592_v30 }
  0x89   :  { %1791 = vmatprep.subr.mxu0 %v1872_v25  ;;  %1798 = vmatprep.subr.mxu1 %v1872_v25 }
  0x8a   :  { %1792 = vmatpush3.msra.mxu0 %v2649_v26  ;;  %1799 = vmatpush3.msra.mxu1 %v2567_v42 }
  0x8b   :  { %1793 = vmatprep.subr.mxu0 %v1872_v25  ;;  %1800 = vmatprep.subr.mxu1 %v1872_v25 }
  0x8c   :  { %1794 = vmatpush3.msra.mxu0 %v2660_v29  ;;  %1795 = vmatprep.mubr.msk.f32.mxu0 %vm1873_vm2, %v1872_v25 }
  0x8d   :  { %1801 = vmatpush3.msra.mxu1 %v2575_v28  ;;  %1796 = vmatmul.mubr.f32.vlgmr.msra.gmra.mxu0 %v2621_v56 }
  0x8e   :  { %1802 = vmatprep.subr.mxu1 %v1872_v25  ;;  %1813 = vmatprep.subr.mxu0 %v1872_v25 }
  0x8f   :  { %1803 = vmatpush3.msra.mxu1 %v2597_v19  ;;  %1814 = vmatpush3.msra.mxu0 %v1027_v37 }
  0x90   :  { %1804 = vmatprep.subr.mxu1 %v1872_v25  ;;  %1815 = vmatprep.subr.mxu0 %v1872_v25 }
  0x91   :  { %1805 = vmatpush3.msra.mxu1 %v2611_v44  ;;  %1816 = vmatpush3.msra.mxu0 %v1034_v31 }
  0x92   :  { %1806 = vmatprep.subr.mxu1 %v1872_v25  ;;  %1817 = vmatprep.subr.mxu0 %v1872_v25 }
  0x93   :  { %1807 = vmatpush3.msra.mxu1 %v2628_v23  ;;  %1818 = vmatpush3.msra.mxu0 %v1041_v40 }
  0x94   :  { %1808 = vmatprep.subr.mxu1 %v1872_v25  ;;  %1819 = vmatprep.subr.mxu0 %v1872_v25 }
  0x95   :  { %1809 = vmatpush3.msra.mxu1 %v2638_v35  ;;  %1810 = vmatprep.mubr.msk.f32.mxu1 %vm1873_vm2, %v1872_v25 }
  0x96   :  { %1820 = vmatpush3.msra.mxu0 %v1048_v45  ;;  %1811 = vmatmul.mubr.f32.vlgmr.msra.gmra.mxu1 %v996_v43 }
  0x97   :  { %1821 = vmatprep.subr.mxu0 %v1872_v25  ;;  %1828 = vmatprep.subr.mxu1 %v1872_v25 }
  0x98   :  { %1822 = vmatpush3.msra.mxu0 %v1055_v0  ;;  %1829 = vmatpush3.msra.mxu1 %v2567_v42 }
  0x99   :  { %1823 = vmatprep.subr.mxu0 %v1872_v25  ;;  %1830 = vmatprep.subr.mxu1 %v1872_v25 }
  0x9a   :  { %1824 = vmatpush3.msra.mxu0 %v1062_v3  ;;  %1825 = vmatprep.mubr.msk.f32.mxu0 %vm1873_vm2, %v1872_v25 }
  0x9b   :  { %1831 = vmatpush3.msra.mxu1 %v2575_v28  ;;  %1826 = vmatmul.mubr.f32.vlgmr.msra.gmra.mxu0 %v2592_v30 }
  0x9c   :  { %1832 = vmatprep.subr.mxu1 %v1872_v25  ;;  %1840 = vmatprep.mubr.msk.f32.mxu1 %vm1873_vm2, %v1872_v25 }
  0x9d   :  { %1833 = vmatpush3.msra.mxu1 %v2597_v19 }
  0x9e   :  { %1834 = vmatprep.subr.mxu1 %v1872_v25 }
  0x9f   :  { %1835 = vmatpush3.msra.mxu1 %v2611_v44 }
  0xa0   :  { %1836 = vmatprep.subr.mxu1 %v1872_v25 }
  0xa1   :  { %1837 = vmatpush3.msra.mxu1 %v2628_v23 }
  0xa2   :  { %1838 = vmatprep.subr.mxu1 %v1872_v25 }
  0xa3   :  { %1839 = vmatpush3.msra.mxu1 %v2638_v35 }
  0xa4   :  { %1841 = vmatmul.mubr.f32.vlgmr.msra.gmra.mxu1 %v2592_v30 }
  0xee   :  { %v1533_v17 = vpop.f32.mrf.mxu0 }
  0xf0   :  { %v1534_v22 = vpop.f32.mrf.mxu0 }
  0xf1   :  { %v1535_v32 = vadd.f32 %v1534_v22, %v1533_v17 }
  0xf7   :  { %v1568_v24 = vpop.f32.mrf.mxu1 }
  0xf9   :  { %v1569_v60 = vpop.f32.mrf.mxu1 }
  0xfa   :  { %v1570_v57 = vadd.f32 %v1569_v60, %v1568_v24 }
  0xfc   :  { %v402_v61 = vadd.f32 %v1570_v57, %v1535_v32 }
 0x10f   :  { %v1603_v34 = vpop.f32.mrf.mxu0 }
 0x111   :  { %v1604_v55 = vpop.f32.mrf.mxu0 }
 0x112   :  { %v1605_v19 = vadd.f32 %v1604_v55, %v1603_v34 }
 0x114   :  { %v540_v62 = vadd.f32 %v1605_v19, %v402_v61 }
 0x118   :  { %v1638_v42 = vpop.f32.mrf.mxu1 }
 0x11a   :  { %v1639_v21 = vpop.f32.mrf.mxu1 }
 0x11b   :  { %v1640_v13 = vadd.f32 %v1639_v21, %v1638_v42 }
 0x11d   :  { %v648_v52 = vadd.f32 %v1640_v13, %v540_v62 }
 0x131   :  { %v1673_v8 = vpop.f32.mrf.mxu0 }
 0x133   :  { %v1674_v48 = vpop.f32.mrf.mxu0 }
 0x134   :  { %v1675_v33 = vadd.f32 %v1674_v48, %v1673_v8 }
 0x136   :  { %v816_v41 = vadd.f32 %v1675_v33, %v648_v52 }
 0x13a   :  { %v1708_v28 = vpop.f32.mrf.mxu1 }
 0x13c   :  { %v1709_v53 = vpop.f32.mrf.mxu1 }
 0x13d   :  { %v1710_v51 = vadd.f32 %v1709_v53, %v1708_v28 }
 0x13f   :  { %v920_v7 = vadd.f32 %v1710_v51, %v816_v41 }
 0x140   :  { %v1000_v6 = vpop.f32.mrf.mxu0 }
 0x141   :  { %v1001_v50 = vadd.f32 %v1000_v6, %v920_v7 }
 0x142   :  { %v1767_v36 = vpop.f32.mrf.mxu0 }
 0x148   :  { %v1101_v46 = vpop.f32.mrf.mxu1 }
 0x149   :  { %v1102_v2 = vadd.f32 %v1101_v46, %v1001_v50 }
 0x14a   :  { %v1782_v1 = vpop.f32.mrf.mxu1 }
 0x14d   :  { %v1185_v30 = vpop.f32.mrf.mxu0 }
 0x14e   :  { %v1186_v27 = vadd.f32 %v1185_v30, %v1102_v2 }
 0x14f   :  { %v1797_v54 = vpop.f32.mrf.mxu0 }
 0x156   :  { %v1264_v44 = vpop.f32.mrf.mxu1 }
 0x157   :  { %v1265_v47 = vadd.f32 %v1264_v44, %v1186_v27 }
 0x158   :  { %v1812_v49 = vpop.f32.mrf.mxu1 }
 0x15b   :  { %v1353_v37 = vpop.f32.mrf.mxu0 }
 0x15c   :  { %v1354_v18 = vadd.f32 %v1353_v37, %v1265_v47 }
 0x15d   :  { %v1827_v56 = vpop.f32.mrf.mxu0 }
 0x164   :  { %v1430_v23 = vpop.f32.mrf.mxu1 }
 0x165   :  { %v1431_v25 = vadd.f32 %v1430_v23, %v1354_v18 }
 0x166   :  { %v1842_v31 = vpop.f32.mrf.mxu1 }
 0x167   :  { %1434 = vxpose.xlu0.b32.start.end [1/1] (short) (narrow) %v1431_v25, 8 }
 0x1e3   :  { %v1450_v63 = vpop.trf.xlu0 }
 0x1e4   :  { %v1467_v35 = vsel %vm1466_vm3, %v1450_v63, -inf }
 0x1e5   :  { %v1468_v39 = vrot.slane %v1467_v35, 4 }
 0x1e7   :  { %v1469_v43 = vmax.f32 %v1467_v35, %v1468_v39 }
 0x1e9   :  { %v1470_v26 = vrot.slane %v1469_v43, 2 }
 0x1eb   :  { %v1471_v40 = vmax.f32 %v1469_v43, %v1470_v26 }
 0x1ed   :  { %v1472_v12 = vrot.slane %v1471_v40, 1 }
 0x1ef   :  { %v1473_v29 = vmax.f32 %v1471_v40, %v1472_v12 }
 0x1f1   :  { %v1474_v45 = vsub.f32 %v1450_v63, %v1473_v29 }
 0x1f3   :  { %v1475_v14 = vmul.f32 1.442695, %v1474_v45 }
 0x1f5   :  { %1846 = vpow2.f32 %v1475_v14 }
 0x202   :  { %v1847_v59 = vpop.eup %1846 }
 0x203   :  { %v1477_v38 = vsel %vm1466_vm3, %v1847_v59, 0.0 }
 0x204   :  { %v1478_v0 = vrot.slane %v1477_v38, 4 }
 0x206   :  { %v1479_v20 = vadd.f32 %v1478_v0, %v1477_v38 }
 0x208   :  { %v1480_v58 = vrot.slane %v1479_v20, 2 }
 0x20a   :  { %v1481_v3 = vadd.f32 %v1480_v58, %v1479_v20 }
 0x20c   :  { %v1482_v4 = vrot.slane %v1481_v3, 1 }
 0x20e   :  { %v1483_v5 = vadd.f32 %v1482_v4, %v1481_v3 }
 0x210   :  { %1848 = vrcp.f32 %v1483_v5 }
 0x21d   :  { %v1849_v9 = vpop.eup %1848 }
 0x21e   :  { %v1485_v10 = vmul.f32 %v1849_v9, %v1847_v59 }
 0x220   :  { %1486 = vst.msk [vmem:[#allocation2] sm:$0xf] %vm1466_vm3, %v1485_v10 }
 0x221   :  { %1861 = shalt.err (!%p1858_p4)
}
 0x222   :  { %1496 = dma.vmem_to_hbm [thread:$0]  %s1494_s6, 64, %s2776_s2, [#allocation3]  }
 0x223   :  { %1870 = dma.done.wait [#allocation3], 64  }
 0x224   :  { %1871 = vsyncadd [#allocation3], 4294967232 }
 0x225   :  { %1500 = vsyncpa [#allocation3], 1 }

</bundles_post_ra>
